<compile_context>
chip_gen: v7x
topology: tpu7x:2x2x1
jax: 0.10.0
libtpu: 0.0.40
codegen_flags: <defaults>
</compile_context>

<pallas_src>
import functools

import jax
import jax.numpy as jnp
from jax.experimental import pallas as pl
from jax.experimental.pallas import tpu as pltpu


def _truncation_kernel(avg_ref, x_ref, o_ref, *, threshold, max_layer):
    # avg_ref: (1, D) average dlatent (resident across the grid)
    # x_ref / o_ref: (bN, L, D)
    x = x_ref[...]
    avg = avg_ref[...][None, :, :]                       # (1, 1, D) broadcast
    t = jnp.asarray(threshold, dtype=x.dtype)
    interp = avg + t * (x - avg)                         # torch.lerp(avg, x, t)
    layer = jax.lax.broadcasted_iota(jnp.int32, x.shape, dimension=1)
    o_ref[...] = jnp.where(layer < max_layer, interp, x)


def truncation(x, avg_latent, *, max_layer=8, threshold=0.7):
    """Pallas equivalent of Truncation(avg_latent, device, max_layer, threshold).forward(x)."""
    assert x.ndim == 3, "x must be (batch, num_layers, dlatent_dim)"
    N, L, D = x.shape
    avg2d = jnp.asarray(avg_latent, dtype=x.dtype).reshape(1, D)

    # Batch tile: target ~2 MiB per x-block (output block is the same size),
    # so input+output double-buffered stays well under every chip's VMEM
    # budget; the ragged last block is handled by the cdiv grid.
    bytes_per_row = L * D * x.dtype.itemsize
    target_block_bytes = 2 * 1024 * 1024
    bN = max(1, min(N, target_block_bytes // max(1, bytes_per_row)))
    grid = (pl.cdiv(N, bN),)

    kernel = functools.partial(
        _truncation_kernel, threshold=float(threshold), max_layer=int(max_layer)
    )
    # TODO(synk): if max_layer/threshold ever become runtime tensors, move them
    # to SMEM via PrefetchScalarGridSpec(num_scalar_prefetch=...) instead.

    return pl.pallas_call(
        kernel,
        out_shape=jax.ShapeDtypeStruct((N, L, D), x.dtype),
        grid_spec=pltpu.PrefetchScalarGridSpec(
            num_scalar_prefetch=0,
            grid=grid,
            in_specs=[
                pl.BlockSpec((1, D), lambda i: (0, 0)),        # avg_latent
                pl.BlockSpec((bN, L, D), lambda i: (i, 0, 0)),  # x
            ],
            out_specs=pl.BlockSpec((bN, L, D), lambda i: (i, 0, 0)),
        ),
        compiler_params=pltpu.CompilerParams(
            dimension_semantics=("parallel",),
        ),
    )(avg2d, x)


def _reference(x, avg_latent, *, max_layer=8, threshold=0.7):
    # Pure-JAX reference of the PyTorch forward.
    avg = jnp.asarray(avg_latent, x.dtype).reshape(1, 1, -1)
    interp = avg + jnp.asarray(threshold, x.dtype) * (x - avg)
    do_trunc = (jnp.arange(x.shape[1]) < max_layer)[None, :, None]
    return jnp.where(do_trunc, interp, x)


if __name__ == "__main__":
    key = jax.random.PRNGKey(0)
    k1, k2 = jax.random.split(key)

    # Small but representative shapes: batch=2, 12 style layers, 256-dim dlatent
    # (max_layer=8 < 12 so both the truncated and pass-through branches run).
    N, L, D = 2, 12, 256
    x = jax.random.normal(k1, (N, L, D), dtype=jnp.float32)
    avg_latent = jax.random.normal(k2, (D,), dtype=jnp.float32)

    y = truncation(x, avg_latent, max_layer=8, threshold=0.7)
    y = jax.block_until_ready(y)

    ref = _reference(x, avg_latent, max_layer=8, threshold=0.7)
    assert y.shape == x.shape and y.dtype == x.dtype
    assert jnp.allclose(y, ref, atol=1e-6, rtol=1e-6)
    print("KERNEL_OK")
</pallas_src>

<mosaic_0001>
module attributes {stable_mosaic.version = 11 : i64} {
  func.func @_truncation_kernel(%arg0: i32, %arg1: memref<1x256xf32, #tpu.memory_space<vmem>>, %arg2: memref<2x12x256xf32, #tpu.memory_space<vmem>>, %arg3: memref<2x12x256xf32, #tpu.memory_space<vmem>>) attributes {dimension_semantics = [#tpu.dimension_semantics<parallel>], iteration_bounds = array<i64: 1>, scalar_prefetch = 0 : i64, scratch_operands = 0 : i64, tpu.core_type = #tpu.core_type<tc>, window_params = [{pipeline_mode = #tpu.pipeline_mode<synchronous>, transform_indices = @transform_0, window_bounds = array<i64: 1, 256>}, {transform_indices = @transform_1, window_bounds = array<i64: 2, 12, 256>}, {transform_indices = @transform_2, window_bounds = array<i64: 2, 12, 256>}]} {
    %c0 = arith.constant 0 : index
    %c0_0 = arith.constant 0 : index
    %c0_1 = arith.constant 0 : index
    %0 = vector.load %arg2[%c0, %c0_0, %c0_1] : memref<2x12x256xf32, #tpu.memory_space<vmem>>, vector<2x12x256xf32>
    %c0_2 = arith.constant 0 : index
    %c0_3 = arith.constant 0 : index
    %1 = vector.load %arg1[%c0_2, %c0_3] : memref<1x256xf32, #tpu.memory_space<vmem>>, vector<1x256xf32>
    %2 = vector.shape_cast %1 : vector<1x256xf32> to vector<1x1x256xf32>
    %3 = vector.broadcast %2 : vector<1x1x256xf32> to vector<2x12x256xf32>
    %4 = arith.subf %0, %3 : vector<2x12x256xf32>
    %cst = arith.constant 0.699999988 : f32
    %5 = vector.broadcast %cst : f32 to vector<2x12x256xf32>
    %6 = arith.mulf %5, %4 : vector<2x12x256xf32>
    %7 = vector.broadcast %2 : vector<1x1x256xf32> to vector<2x12x256xf32>
    %8 = arith.addf %7, %6 : vector<2x12x256xf32>
    %9 = tpu.iota {dimensions = array<i32: 1>} : vector<2x12x256xi32>
    %c8_i32 = arith.constant 8 : i32
    %10 = vector.broadcast %c8_i32 : i32 to vector<2x12x256xi32>
    %11 = arith.cmpi slt, %9, %10 : vector<2x12x256xi32>
    %12 = arith.select %11, %8, %0 : vector<2x12x256xi1>, vector<2x12x256xf32>
    %c0_4 = arith.constant 0 : index
    %c0_5 = arith.constant 0 : index
    %c0_6 = arith.constant 0 : index
    %13 = vector.load %arg3[%c0_4, %c0_5, %c0_6] : memref<2x12x256xf32, #tpu.memory_space<vmem>>, vector<2x12x256xf32>
    tpu.vector_store %arg3[%c0_4, %c0_5, %c0_6], %12 {strides = array<i32>} : memref<2x12x256xf32, #tpu.memory_space<vmem>>, vector<2x12x256xf32>,
    return
  }
  func.func @transform_0(%arg0: i32) -> (i32, i32) {
    %c0_i32 = arith.constant 0 : i32
    %c0_i32_0 = arith.constant 0 : i32
    %c0_i32_1 = arith.constant 0 : i32
    return %c0_i32, %c0_i32_0 : i32, i32
  }
  func.func @transform_1(%arg0: i32) -> (i32, i32, i32) {
    %c0_i32 = arith.constant 0 : i32
    %c0_i32_0 = arith.constant 0 : i32
    %c0_i32_1 = arith.constant 0 : i32
    return %arg0, %c0_i32, %c0_i32_0 : i32, i32, i32
  }
  func.func @transform_2(%arg0: i32) -> (i32, i32, i32) {
    %c0_i32 = arith.constant 0 : i32
    %c0_i32_0 = arith.constant 0 : i32
    %c0_i32_1 = arith.constant 0 : i32
    return %arg0, %c0_i32, %c0_i32_0 : i32, i32, i32
  }
}

</mosaic_0001>

<bundles_post_ra>
// kernel: tpu_custom_call.1
= control target key start
LH: loop header
LB: loop body
LE: loop exit
PB: predicated region body
PF: predicated region fallthrough
CT: control target
= control target key end

     0   :  { %v21_v0 = vlaneseq  ;;  %s146_s0 = inlined_call_operand.vmem [shape: f32[1,256], index: 0, kind: input, shape index: {}]   ;;  %s147_s2 = inlined_call_operand.vmem [shape: f32[2,12,256], index: 2, kind: output, shape index: {}]   ;;  %s148_s1 = inlined_call_operand.vmem [shape: f32[2,12,256], index: 1, kind: input, shape index: {}]  }
   0x1   :  { %v13_v2 = vld [vmem:[%s148_s1 + $0x10] sm:$0xf]  ;;  %v14_v3 = vld [vmem:[%s148_s1 + $0x18] sm:$0xf]  ;;  %v19_v4 = vld [vmem:[%s146_s0] sm:$0x3] }
   0x2   :  { %v22_v1 = vshrl.u32 %v21_v0, 7  ;;  %70 = vst [vmem:[%s147_s2 + $0x10] sm:$0xf] %v13_v2  ;;  %71 = vst [vmem:[%s147_s2 + $0x18] sm:$0xf] %v14_v3  ;;  %v11_v7 = vld [vmem:[%s148_s1] sm:$0xff] }
   0x3   :  { %v17_v5 = vld [vmem:[%s148_s1 + $0x30] sm:$0xf]  ;;  %v18_v6 = vld [vmem:[%s148_s1 + $0x38] sm:$0xf]  ;;  %v12_v10 = vld [vmem:[%s148_s1 + $0x8] sm:$0xff] }
   0x4   :  { %v23_v8 = vsub.s32 0, %v22_v1  ;;  %v27_v9 = vsub.s32 1, %v22_v1  ;;  %74 = vst [vmem:[%s147_s2 + $0x30] sm:$0xf] %v17_v5  ;;  %75 = vst [vmem:[%s147_s2 + $0x38] sm:$0xf] %v18_v6 }
   0x5   :  { %v15_v11 = vld [vmem:[%s148_s1 + $0x20] sm:$0xff]  ;;  %v16_v12 = vld [vmem:[%s148_s1 + $0x28] sm:$0xff] }
   0x6   :  { %v24_v13 = vrot.slane %v19_v4, %v23_v8  ;;  %v28_v14 = vrot.slane %v19_v4, %v27_v9 }
   0x8   :  { %v31_v15 = vsub.f32 %v11_v7, %v24_v13  ;;  %v32_v16 = vsub.f32 %v12_v10, %v28_v14  ;;  %v35_v17 = vsub.f32 %v15_v11, %v24_v13  ;;  %v36_v18 = vsub.f32 %v16_v12, %v28_v14 }
   0xa   :  { %v39_v19 = vmul.f32 0.7, %v31_v15  ;;  %v40_v20 = vmul.f32 0.7, %v32_v16  ;;  %v43_v21 = vmul.f32 0.7, %v35_v17 }
   0xb   :  { %v44_v22 = vmul.f32 0.7, %v36_v18 }
   0xc   :  { %v47_v23 = vadd.f32 %v39_v19, %v24_v13  ;;  %v48_v24 = vadd.f32 %v40_v20, %v28_v14  ;;  %v51_v25 = vadd.f32 %v43_v21, %v24_v13 }
   0xd   :  { %v52_v26 = vadd.f32 %v44_v22, %v28_v14 }
   0xe   :  { %68 = vst [vmem:[%s147_s2] sm:$0xff] %v47_v23  ;;  %69 = vst [vmem:[%s147_s2 + $0x8] sm:$0xff] %v48_v24 }
   0xf   :  { %72 = vst [vmem:[%s147_s2 + $0x20] sm:$0xff] %v51_v25  ;;  %73 = vst [vmem:[%s147_s2 + $0x28] sm:$0xff] %v52_v26 }

</bundles_post_ra>
